<compile_context>
chip_gen: v6e
topology: v6e:2x2x1
jax: 0.10.0
libtpu: 0.0.40
codegen_flags: <defaults>
</compile_context>

<pallas_src>
import functools

import jax
import jax.numpy as jnp
from jax.experimental import pallas as pl
from jax.experimental.pallas import tpu as pltpu


def _round_up(n, m):
    return ((n + m - 1) // m) * m


# Rows per batch tile are kept a multiple of 16 so bf16 sublane packing never
# straddles a tile boundary (also a multiple of 8, so always legal for f32).
_ROW_ALIGN = 16


def autoencoder_kernel(x_ref,
                       w1_ref, b1_ref, w2_ref, b2_ref,
                       w34_ref, b34_ref, w5_ref, b5_ref, w6_ref, b6_ref,
                       out_ref):
    """Forward pass for one batch tile: 5 matmuls + biases + ReLUs.

    MXU inputs use the weights' dtype (bf16 by default); accumulation, bias add
    and ReLU stay f32 (v5e VPU has no bf16 elementwise).
    """
    mxu_dtype = w1_ref.dtype

    def dense(h, w_ref, b_ref, relu):
        y = jnp.dot(h.astype(mxu_dtype), w_ref[...],
                    preferred_element_type=jnp.float32) + b_ref[...]
        return jnp.maximum(y, 0.0) if relu else y

    h = x_ref[...]
    h = dense(h, w1_ref, b1_ref, relu=True)     # encoder L1 + ReLU
    h = dense(h, w2_ref, b2_ref, relu=True)     # encoder L2 + ReLU
    h = dense(h, w34_ref, b34_ref, relu=True)   # folded (enc latent -> dec L2) + ReLU
    h = dense(h, w5_ref, b5_ref, relu=True)     # decoder L1 + ReLU
    h = dense(h, w6_ref, b6_ref, relu=False)    # decoder output (no activation)
    out_ref[...] = h.astype(out_ref.dtype)


def prepare_params(params, matmul_dtype=jnp.bfloat16):
    """One-time parameter preprocessing (call once, outside the forward loop).

    Folds the no-activation latent bottleneck into a single [L2, L2] layer:
        (h @ w3 + b3) @ w4 + b4 == h @ (w3 @ w4) + (b3 @ w4 + b4)
    and casts weights to the MXU input dtype.  Biases stay f32.
    """
    (w1, b1), (w2, b2), (w3, b3) = params["enc"]
    (w4, b4), (w5, b5), (w6, b6) = params["dec"]

    w34 = w3 @ w4
    b34 = b3 @ w4 + b4

    flat = []
    for w, b in ((w1, b1), (w2, b2), (w34, b34), (w5, b5), (w6, b6)):
        flat.append(jnp.asarray(w, dtype=matmul_dtype))
        flat.append(jnp.asarray(b, dtype=jnp.float32))
    return tuple(flat)


def autoencoder_forward(x, prepared_params, *, batch_tile=1024):
    """x: [B, input_dim].  prepared_params: output of prepare_params()."""
    B, input_dim = x.shape
    out_dtype = x.dtype
    matmul_dtype = prepared_params[0].dtype

    # --- batch tiling: balanced tiles, >= 2 (even) grid steps when B > 16 so
    #     the "parallel" axis shards across both v7x TensorCores ---
    b_r = _round_up(B, _ROW_ALIGN)
    num_tiles = max(pl.cdiv(b_r, batch_tile), 2 if b_r > _ROW_ALIGN else 1)
    if num_tiles > 1:
        num_tiles = _round_up(num_tiles, 2)
    bt = _round_up(pl.cdiv(b_r, num_tiles), _ROW_ALIGN)
    b_pad = num_tiles * bt

    # MXU-input dtype at the HBM boundary (halves the activation read in bf16);
    # only row padding, never lane padding.
    x_p = x.astype(matmul_dtype)
    if b_pad != B:
        x_p = jnp.pad(x_p, ((0, b_pad - B), (0, 0)))

    # x/out tiles: default double-buffered pipeline along the batch grid axis.
    in_specs = [pl.BlockSpec((bt, input_dim), lambda i: (i, 0))]
    # Weights/biases: whole (tiny) array resident, constant index_map,
    # single-buffered so no wasted second VMEM buffer or re-issued DMAs.
    for p in prepared_params:
        in_specs.append(
            pl.BlockSpec(p.shape, lambda i: (0, 0),
                         pipeline_mode=pl.Buffered(buffer_count=1)))
    out_spec = pl.BlockSpec((bt, input_dim), lambda i: (i, 0))

    fn = pl.pallas_call(
        autoencoder_kernel,
        out_shape=jax.ShapeDtypeStruct((b_pad, input_dim), out_dtype),
        grid_spec=pltpu.PrefetchScalarGridSpec(
            num_scalar_prefetch=0,
            grid=(num_tiles,),
            in_specs=in_specs,
            out_specs=out_spec,
        ),
        compiler_params=pltpu.CompilerParams(
            dimension_semantics=("parallel",),   # batch axis shards across TCs
            # Let XLA fuse the wrapper-side cast/row-pad of x into the kernel input.
            allow_input_fusion=[True] + [False] * len(prepared_params),
        ),
    )
    out = fn(x_p, *prepared_params)
    if b_pad != B:
        out = out[:B]
    return out


def init_linear(key, fan_in, fan_out):
    """PyTorch-style uniform(-1/sqrt(fan_in), 1/sqrt(fan_in)); W stored as [in, out]."""
    kw, kb = jax.random.split(key)
    bound = 1.0 / jnp.sqrt(float(fan_in))
    w = jax.random.uniform(kw, (fan_in, fan_out), jnp.float32, -bound, bound)
    b = jax.random.uniform(kb, (1, fan_out), jnp.float32, -bound, bound)
    return w, b


def make_params(key, input_dim, layer1, layer2, latent_dim):
    keys = jax.random.split(key, 6)
    enc = [
        init_linear(keys[0], input_dim, layer1),
        init_linear(keys[1], layer1, layer2),
        init_linear(keys[2], layer2, latent_dim),
    ]
    dec = [
        init_linear(keys[3], latent_dim, layer2),
        init_linear(keys[4], layer2, layer1),
        init_linear(keys[5], layer1, input_dim),
    ]
    return {"enc": enc, "dec": dec}


def reference_forward(x, params):
    """Plain-JAX reference matching the PyTorch forward semantics (unfused)."""
    (w1, b1), (w2, b2), (w3, b3) = params["enc"]
    (w4, b4), (w5, b5), (w6, b6) = params["dec"]
    h = jnp.maximum(x @ w1 + b1, 0.0)
    h = jnp.maximum(h @ w2 + b2, 0.0)
    latent = h @ w3 + b3
    h = jnp.maximum(latent @ w4 + b4, 0.0)
    h = jnp.maximum(h @ w5 + b5, 0.0)
    return h @ w6 + b6


if __name__ == "__main__":
    # Small deterministic config (NNI hyperparameters chosen in-script).
    batch = 16
    input_dim = 32       # X_train.shape[1]
    layer1_neurons = 64
    layer2_neurons = 32
    latent_dim = 5

    key = jax.random.PRNGKey(0)
    kx, kp, kx2, kx3 = jax.random.split(key, 4)

    # MinMaxScaler output lives in [0, 1]; emulate with uniform inputs.
    x = jax.random.uniform(kx, (batch, input_dim), jnp.float32)
    params = make_params(kp, input_dim, layer1_neurons, layer2_neurons, latent_dim)
    ref = reference_forward(x, params)

    fwd = jax.jit(autoencoder_forward, static_argnames=("batch_tile",))

    # One-time parameter preparation (hoisted out of the per-call path).
    prepared_f32 = prepare_params(params, matmul_dtype=jnp.float32)
    prepared_bf16 = prepare_params(params)  # default bf16 MXU inputs

    # 1) f32 path, whole batch in one tile (grid=(1,)).
    out_f32 = jax.block_until_ready(fwd(x, prepared_f32))
    assert out_f32.shape == (batch, input_dim)
    assert jnp.allclose(out_f32, ref, atol=1e-5, rtol=1e-5)

    # 2) Default bf16 MXU inputs (f32 accumulate + f32 bias/ReLU).
    out_bf16 = jax.block_until_ready(fwd(x, prepared_bf16))
    assert jnp.allclose(out_bf16, ref, atol=5e-2, rtol=5e-2)

    # 3) Larger batch exercising the tiled path (>= 2 grid steps for megacore).
    x_big = jax.random.uniform(kx2, (512, input_dim), jnp.float32)
    out_big = jax.block_until_ready(fwd(x_big, prepared_f32))
    assert jnp.allclose(out_big, reference_forward(x_big, params), atol=1e-5, rtol=1e-5)

    # 4) Ragged batch: balanced tiles + row padding/slicing correctness.
    x_rag = jax.random.uniform(kx3, (300, input_dim), jnp.float32)
    out_rag = jax.block_until_ready(fwd(x_rag, prepared_bf16))
    assert out_rag.shape == (300, input_dim)
    assert jnp.allclose(out_rag, reference_forward(x_rag, params), atol=5e-2, rtol=5e-2)

    print("KERNEL_OK")
</pallas_src>

<mosaic_0001>
module attributes {stable_mosaic.version = 11 : i64} {
  func.func @autoencoder_kernel(%arg0: i32, %arg1: memref<16x32xf32, #tpu.memory_space<vmem>>, %arg2: memref<32x64xf32, #tpu.memory_space<vmem>>, %arg3: memref<1x64xf32, #tpu.memory_space<vmem>>, %arg4: memref<64x32xf32, #tpu.memory_space<vmem>>, %arg5: memref<1x32xf32, #tpu.memory_space<vmem>>, %arg6: memref<32x32xf32, #tpu.memory_space<vmem>>, %arg7: memref<1x32xf32, #tpu.memory_space<vmem>>, %arg8: memref<32x64xf32, #tpu.memory_space<vmem>>, %arg9: memref<1x64xf32, #tpu.memory_space<vmem>>, %arg10: memref<64x32xf32, #tpu.memory_space<vmem>>, %arg11: memref<1x32xf32, #tpu.memory_space<vmem>>, %arg12: memref<16x32xf32, #tpu.memory_space<vmem>>) attributes {dimension_semantics = [#tpu.dimension_semantics<parallel>], iteration_bounds = array<i64: 1>, scalar_prefetch = 0 : i64, scratch_operands = 0 : i64, tpu.core_type = #tpu.core_type<tc>, window_params = [{transform_indices = @transform_0, window_bounds = array<i64: 16, 32>}, {pipeline_mode = #tpu.pipeline_mode<synchronous>, transform_indices = @transform_1, window_bounds = array<i64: 32, 64>}, {pipeline_mode = #tpu.pipeline_mode<synchronous>, transform_indices = @transform_2, window_bounds = array<i64: 1, 64>}, {pipeline_mode = #tpu.pipeline_mode<synchronous>, transform_indices = @transform_3, window_bounds = array<i64: 64, 32>}, {pipeline_mode = #tpu.pipeline_mode<synchronous>, transform_indices = @transform_4, window_bounds = array<i64: 1, 32>}, {pipeline_mode = #tpu.pipeline_mode<synchronous>, transform_indices = @transform_5, window_bounds = array<i64: 32, 32>}, {pipeline_mode = #tpu.pipeline_mode<synchronous>, transform_indices = @transform_6, window_bounds = array<i64: 1, 32>}, {pipeline_mode = #tpu.pipeline_mode<synchronous>, transform_indices = @transform_7, window_bounds = array<i64: 32, 64>}, {pipeline_mode = #tpu.pipeline_mode<synchronous>, transform_indices = @transform_8, window_bounds = array<i64: 1, 64>}, {pipeline_mode = #tpu.pipeline_mode<synchronous>, transform_indices = @transform_9, window_bounds = array<i64: 64, 32>}, {pipeline_mode = #tpu.pipeline_mode<synchronous>, transform_indices = @transform_10, window_bounds = array<i64: 1, 32>}, {transform_indices = @transform_11, window_bounds = array<i64: 16, 32>}]} {
    %c0 = arith.constant 0 : index
    %c0_0 = arith.constant 0 : index
    %0 = vector.load %arg1[%c0, %c0_0] : memref<16x32xf32, #tpu.memory_space<vmem>>, vector<16x32xf32>
    %c0_1 = arith.constant 0 : index
    %c0_2 = arith.constant 0 : index
    %1 = vector.load %arg2[%c0_1, %c0_2] : memref<32x64xf32, #tpu.memory_space<vmem>>, vector<32x64xf32>
    %cst = arith.constant dense<0.000000e+00> : vector<16x64xf32>
    %2 = tpu.matmul %0, %1, %cst {dimension_numbers = #tpu.dot_dimension_numbers<[1], [0], [0], [1], [0, 0, 1, 1], [], []>} : vector<16x32xf32>, vector<32x64xf32>, vector<16x64xf32> -> vector<16x64xf32>
    %c0_3 = arith.constant 0 : index
    %c0_4 = arith.constant 0 : index
    %3 = vector.load %arg3[%c0_3, %c0_4] : memref<1x64xf32, #tpu.memory_space<vmem>>, vector<1x64xf32>
    %4 = vector.broadcast %3 : vector<1x64xf32> to vector<16x64xf32>
    %5 = arith.addf %2, %4 : vector<16x64xf32>
    %cst_5 = arith.constant 0.000000e+00 : f32
    %6 = vector.broadcast %cst_5 : f32 to vector<16x64xf32>
    %7 = arith.maximumf %5, %6 : vector<16x64xf32>
    %c0_6 = arith.constant 0 : index
    %c0_7 = arith.constant 0 : index
    %8 = vector.load %arg4[%c0_6, %c0_7] : memref<64x32xf32, #tpu.memory_space<vmem>>, vector<64x32xf32>
    %cst_8 = arith.constant dense<0.000000e+00> : vector<16x32xf32>
    %9 = tpu.matmul %7, %8, %cst_8 {dimension_numbers = #tpu.dot_dimension_numbers<[1], [0], [0], [1], [0, 0, 1, 1], [], []>} : vector<16x64xf32>, vector<64x32xf32>, vector<16x32xf32> -> vector<16x32xf32>
    %c0_9 = arith.constant 0 : index
    %c0_10 = arith.constant 0 : index
    %10 = vector.load %arg5[%c0_9, %c0_10] : memref<1x32xf32, #tpu.memory_space<vmem>>, vector<1x32xf32>
    %11 = vector.broadcast %10 : vector<1x32xf32> to vector<16x32xf32>
    %12 = arith.addf %9, %11 : vector<16x32xf32>
    %cst_11 = arith.constant 0.000000e+00 : f32
    %13 = vector.broadcast %cst_11 : f32 to vector<16x32xf32>
    %14 = arith.maximumf %12, %13 : vector<16x32xf32>
    %c0_12 = arith.constant 0 : index
    %c0_13 = arith.constant 0 : index
    %15 = vector.load %arg6[%c0_12, %c0_13] : memref<32x32xf32, #tpu.memory_space<vmem>>, vector<32x32xf32>
    %cst_14 = arith.constant dense<0.000000e+00> : vector<16x32xf32>
    %16 = tpu.matmul %14, %15, %cst_14 {dimension_numbers = #tpu.dot_dimension_numbers<[1], [0], [0], [1], [0, 0, 1, 1], [], []>} : vector<16x32xf32>, vector<32x32xf32>, vector<16x32xf32> -> vector<16x32xf32>
    %c0_15 = arith.constant 0 : index
    %c0_16 = arith.constant 0 : index
    %17 = vector.load %arg7[%c0_15, %c0_16] : memref<1x32xf32, #tpu.memory_space<vmem>>, vector<1x32xf32>
    %18 = vector.broadcast %17 : vector<1x32xf32> to vector<16x32xf32>
    %19 = arith.addf %16, %18 : vector<16x32xf32>
    %cst_17 = arith.constant 0.000000e+00 : f32
    %20 = vector.broadcast %cst_17 : f32 to vector<16x32xf32>
    %21 = arith.maximumf %19, %20 : vector<16x32xf32>
    %c0_18 = arith.constant 0 : index
    %c0_19 = arith.constant 0 : index
    %22 = vector.load %arg8[%c0_18, %c0_19] : memref<32x64xf32, #tpu.memory_space<vmem>>, vector<32x64xf32>
    %cst_20 = arith.constant dense<0.000000e+00> : vector<16x64xf32>
    %23 = tpu.matmul %21, %22, %cst_20 {dimension_numbers = #tpu.dot_dimension_numbers<[1], [0], [0], [1], [0, 0, 1, 1], [], []>} : vector<16x32xf32>, vector<32x64xf32>, vector<16x64xf32> -> vector<16x64xf32>
    %c0_21 = arith.constant 0 : index
    %c0_22 = arith.constant 0 : index
    %24 = vector.load %arg9[%c0_21, %c0_22] : memref<1x64xf32, #tpu.memory_space<vmem>>, vector<1x64xf32>
    %25 = vector.broadcast %24 : vector<1x64xf32> to vector<16x64xf32>
    %26 = arith.addf %23, %25 : vector<16x64xf32>
    %cst_23 = arith.constant 0.000000e+00 : f32
    %27 = vector.broadcast %cst_23 : f32 to vector<16x64xf32>
    %28 = arith.maximumf %26, %27 : vector<16x64xf32>
    %c0_24 = arith.constant 0 : index
    %c0_25 = arith.constant 0 : index
    %29 = vector.load %arg10[%c0_24, %c0_25] : memref<64x32xf32, #tpu.memory_space<vmem>>, vector<64x32xf32>
    %cst_26 = arith.constant dense<0.000000e+00> : vector<16x32xf32>
    %30 = tpu.matmul %28, %29, %cst_26 {dimension_numbers = #tpu.dot_dimension_numbers<[1], [0], [0], [1], [0, 0, 1, 1], [], []>} : vector<16x64xf32>, vector<64x32xf32>, vector<16x32xf32> -> vector<16x32xf32>
    %c0_27 = arith.constant 0 : index
    %c0_28 = arith.constant 0 : index
    %31 = vector.load %arg11[%c0_27, %c0_28] : memref<1x32xf32, #tpu.memory_space<vmem>>, vector<1x32xf32>
    %32 = vector.broadcast %31 : vector<1x32xf32> to vector<16x32xf32>
    %33 = arith.addf %30, %32 : vector<16x32xf32>
    %c0_29 = arith.constant 0 : index
    %c0_30 = arith.constant 0 : index
    %34 = vector.load %arg12[%c0_29, %c0_30] : memref<16x32xf32, #tpu.memory_space<vmem>>, vector<16x32xf32>
    tpu.vector_store %arg12[%c0_29, %c0_30], %33 {strides = array<i32>} : memref<16x32xf32, #tpu.memory_space<vmem>>, vector<16x32xf32>,
    return
  }
  func.func @transform_0(%arg0: i32) -> (i32, i32) {
    %c0_i32 = arith.constant 0 : i32
    %c0_i32_0 = arith.constant 0 : i32
    return %arg0, %c0_i32 : i32, i32
  }
  func.func @transform_1(%arg0: i32) -> (i32, i32) {
    %c0_i32 = arith.constant 0 : i32
    %c0_i32_0 = arith.constant 0 : i32
    %c0_i32_1 = arith.constant 0 : i32
    return %c0_i32, %c0_i32_0 : i32, i32
  }
  func.func @transform_2(%arg0: i32) -> (i32, i32) {
    %c0_i32 = arith.constant 0 : i32
    %c0_i32_0 = arith.constant 0 : i32
    %c0_i32_1 = arith.constant 0 : i32
    return %c0_i32, %c0_i32_0 : i32, i32
  }
  func.func @transform_3(%arg0: i32) -> (i32, i32) {
    %c0_i32 = arith.constant 0 : i32
    %c0_i32_0 = arith.constant 0 : i32
    %c0_i32_1 = arith.constant 0 : i32
    return %c0_i32, %c0_i32_0 : i32, i32
  }
  func.func @transform_4(%arg0: i32) -> (i32, i32) {
    %c0_i32 = arith.constant 0 : i32
    %c0_i32_0 = arith.constant 0 : i32
    %c0_i32_1 = arith.constant 0 : i32
    return %c0_i32, %c0_i32_0 : i32, i32
  }
  func.func @transform_5(%arg0: i32) -> (i32, i32) {
    %c0_i32 = arith.constant 0 : i32
    %c0_i32_0 = arith.constant 0 : i32
    %c0_i32_1 = arith.constant 0 : i32
    return %c0_i32, %c0_i32_0 : i32, i32
  }
  func.func @transform_6(%arg0: i32) -> (i32, i32) {
    %c0_i32 = arith.constant 0 : i32
    %c0_i32_0 = arith.constant 0 : i32
    %c0_i32_1 = arith.constant 0 : i32
    return %c0_i32, %c0_i32_0 : i32, i32
  }
  func.func @transform_7(%arg0: i32) -> (i32, i32) {
    %c0_i32 = arith.constant 0 : i32
    %c0_i32_0 = arith.constant 0 : i32
    %c0_i32_1 = arith.constant 0 : i32
    return %c0_i32, %c0_i32_0 : i32, i32
  }
  func.func @transform_8(%arg0: i32) -> (i32, i32) {
    %c0_i32 = arith.constant 0 : i32
    %c0_i32_0 = arith.constant 0 : i32
    %c0_i32_1 = arith.constant 0 : i32
    return %c0_i32, %c0_i32_0 : i32, i32
  }
  func.func @transform_9(%arg0: i32) -> (i32, i32) {
    %c0_i32 = arith.constant 0 : i32
    %c0_i32_0 = arith.constant 0 : i32
    %c0_i32_1 = arith.constant 0 : i32
    return %c0_i32, %c0_i32_0 : i32, i32
  }
  func.func @transform_10(%arg0: i32) -> (i32, i32) {
    %c0_i32 = arith.constant 0 : i32
    %c0_i32_0 = arith.constant 0 : i32
    %c0_i32_1 = arith.constant 0 : i32
    return %c0_i32, %c0_i32_0 : i32, i32
  }
  func.func @transform_11(%arg0: i32) -> (i32, i32) {
    %c0_i32 = arith.constant 0 : i32
    %c0_i32_0 = arith.constant 0 : i32
    return %arg0, %c0_i32 : i32, i32
  }
}

</mosaic_0001>

<bundles_post_ra>
// kernel: autoencoder_forward.1
= control target key start
LH: loop header
LB: loop body
LE: loop exit
PB: predicated region body
PF: predicated region fallthrough
CT: control target
= control target key end

     0   :  { %vm52_vm0 = vcmask 261120   ;;  %s869_s0 = inlined_call_operand.vmem [shape: f32[16,32], index: 0, kind: input, shape index: {}]   ;;  %s870_s1 = inlined_call_operand.vmem [shape: f32[32,64], index: 1, kind: input, shape index: {}]   ;;  %s871_s2 = inlined_call_operand.vmem [shape: f32[1,64], index: 2, kind: input, shape index: {}]   ;;  %s872_s3 = inlined_call_operand.vmem [shape: f32[64,32], index: 3, kind: input, shape index: {}]   ;;  %s873_s4 = inlined_call_operand.vmem [shape: f32[1,32], index: 4, kind: input, shape index: {}]   ;;  %s874_s5 = inlined_call_operand.vmem [shape: f32[32,32], index: 5, kind: input, shape index: {}]   ;;  %s875_s6 = inlined_call_operand.vmem [shape: f32[1,32], index: 6, kind: input, shape index: {}]   ;;  %s876_s7 = inlined_call_operand.vmem [shape: f32[32,64], index: 7, kind: input, shape index: {}]   ;;  %s877_s8 = inlined_call_operand.vmem [shape: f32[1,64], index: 8, kind: input, shape index: {}]   ;;  %s878_s9 = inlined_call_operand.vmem [shape: f32[64,32], index: 9, kind: input, shape index: {}]   ;;  %s879_s10 = inlined_call_operand.vmem [shape: f32[1,32], index: 10, kind: input, shape index: {}]   ;;  %s880_s11 = inlined_call_operand.hbm [shape: f32[16,32], index: 11, kind: output, shape index: {}]  }
   0x1   :  { %v44_v0 = vld [vmem:[%s870_s1 + $0x18] sm:$0xff]  ;;  %v43_v1 = vld [vmem:[%s870_s1 + $0x10] sm:$0xff]  ;;  %v39_v2 = vld [vmem:[%s869_s0] sm:$0xff] }
   0x2   :  { %590 = vmatprep.subr.mxu0 %v44_v0  ;;  %v42_v3 = vld [vmem:[%s870_s1 + $0x8] sm:$0xff]  ;;  %598 = vmatprep.mubr.msk.f32.mxu0 %vm52_vm0, %v39_v2  ;;  %v143_v4 = vld [vmem:[%s872_s3 + $0x38] sm:$0xff]  ;;  %v142_v5 = vld [vmem:[%s872_s3 + $0x30] sm:$0xff] }
   0x3   :  { %591 = vmatpush3.msra.mxu0 %v44_v0  ;;  %601 = vmatprep.subr.mxu1 %v143_v4 }
   0x4   :  { %592 = vmatprep.subr.mxu0 %v43_v1 }
   0x5   :  { %16 = vsyncpa [#allocation3], 0  ;;  %593 = vmatpush3.msra.mxu0 %v43_v1  ;;  %v41_v6 = vld [vmem:[%s870_s1] sm:$0xff]  ;;  %602 = vmatpush3.msra.mxu1 %v143_v4  ;;  %v141_v7 = vld [vmem:[%s872_s3 + $0x28] sm:$0xff]  ;;  %vm151_vm1 = vcmask 523264  }
   0x6   :  { %594 = vmatprep.subr.mxu0 %v42_v3  ;;  %603 = vmatprep.subr.mxu1 %v142_v5  ;;  %v40_v8 = vld [vmem:[%s869_s0 + $0x8] sm:$0xff]  ;;  %v140_v9 = vld [vmem:[%s872_s3 + $0x20] sm:$0xff]  ;;  %v139_v10 = vld [vmem:[%s872_s3 + $0x18] sm:$0xff] }
   0x7   :  { %595 = vmatpush3.msra.mxu0 %v42_v3  ;;  %604 = vmatpush3.msra.mxu1 %v142_v5  ;;  %v138_v11 = vld [vmem:[%s872_s3 + $0x10] sm:$0xff]  ;;  %v137_v12 = vld [vmem:[%s872_s3 + $0x8] sm:$0xff]  ;;  %v136_v13 = vld [vmem:[%s872_s3] sm:$0xff] }
   0x8   :  { %596 = vmatprep.subr.mxu0 %v41_v6  ;;  %605 = vmatprep.subr.mxu1 %v141_v7  ;;  %v537_v14 = vld [vmem:[%s871_s2] ss:$0 sm:$0xff]  ;;  %v238_v21 = vld [vmem:[%s874_s5 + $0x18] sm:$0xff]  ;;  %v237_v22 = vld [vmem:[%s874_s5 + $0x10] sm:$0xff] }
   0x9   :  { %597 = vmatpush3.msra.mxu0 %v41_v6  ;;  %606 = vmatpush3.msra.mxu1 %v141_v7  ;;  %v236_v23 = vld [vmem:[%s874_s5 + $0x8] sm:$0xff]  ;;  %v235_v24 = vld [vmem:[%s874_s5] sm:$0xff]  ;;  %v332_v32 = vld [vmem:[%s876_s7 + $0x18] sm:$0xff] }
   0xa   :  { %599 = vmatmul.mubr.msk.f32.vlgmr.msra.gmra.mxu0 %vm52_vm0, %v40_v8  ;;  %607 = vmatprep.subr.mxu1 %v140_v9  ;;  %v540_v25 = vld [vmem:[%s873_s4] ss:$0 sm:$0xff]  ;;  %v331_v33 = vld [vmem:[%s876_s7 + $0x10] sm:$0xff]  ;;  %v330_v34 = vld [vmem:[%s876_s7 + $0x8] sm:$0xff] }
   0xb   :  { %608 = vmatpush3.msra.mxu1 %v140_v9  ;;  %620 = vmatprep.subr.mxu0 %v238_v21  ;;  %v329_v35 = vld [vmem:[%s876_s7] sm:$0xff]  ;;  %v430_v36 = vld [vmem:[%s878_s9 + $0x38] sm:$0xff]  ;;  %v429_v37 = vld [vmem:[%s878_s9 + $0x30] sm:$0xff] }
   0xc   :  { %609 = vmatprep.subr.mxu1 %v139_v10  ;;  %621 = vmatpush3.msra.mxu0 %v238_v21  ;;  %v428_v38 = vld [vmem:[%s878_s9 + $0x28] sm:$0xff]  ;;  %v427_v39 = vld [vmem:[%s878_s9 + $0x20] sm:$0xff]  ;;  %v426_v47 = vld [vmem:[%s878_s9 + $0x18] sm:$0xff] }
   0xd   :  { %610 = vmatpush3.msra.mxu1 %v139_v10  ;;  %622 = vmatprep.subr.mxu0 %v237_v22  ;;  %v543_v40 = vld [vmem:[%s875_s6] ss:$0 sm:$0xff]  ;;  %v425_v48 = vld [vmem:[%s878_s9 + $0x10] sm:$0xff]  ;;  %v424_v49 = vld [vmem:[%s878_s9 + $0x8] sm:$0xff] }
   0xe   :  { %611 = vmatprep.subr.mxu1 %v138_v11  ;;  %623 = vmatpush3.msra.mxu0 %v237_v22  ;;  %v423_v50 = vld [vmem:[%s878_s9] sm:$0xff]  ;;  %s686_s9 = smov [#allocation2]  }
   0xf   :  { %612 = vmatpush3.msra.mxu1 %v138_v11  ;;  %624 = vmatprep.subr.mxu0 %v236_v23  ;;  %v546_v51 = vld [vmem:[%s877_s8] ss:$0 sm:$0xff]  ;;  %s526_s17 = sshll.u32 %s686_s9, 4  ;;  %s527_s17 = int_to_ptr.vmem [resolvable:$true] %s526_s17 }
  0x10   :  { %613 = vmatprep.subr.mxu1 %v137_v12  ;;  %625 = vmatpush3.msra.mxu0 %v236_v23  ;;  %v549_v58 = vld [vmem:[%s879_s10] ss:$0 sm:$0xff]  ;;  %s664_s8 = scalar_lea.vmem %s527_s17, 256  ;;  %p669_p1 = scmp.lt.s32.totalorder %s527_s17, %s527_s17 }
  0x11   :  { %614 = vmatpush3.msra.mxu1 %v137_v12  ;;  %626 = vmatprep.subr.mxu0 %v235_v24  ;;  %p665_p0 = scmp.ne.s32.totalorder %s527_s17, %s664_s8  ;;  %p670_p2 = scmp.lt.s32.totalorder %s664_s8, %s664_s8 }
  0x12   :  { %615 = vmatprep.subr.mxu1 %v136_v13  ;;  %627 = vmatpush3.msra.mxu0 %v235_v24 }
  0x13   :  { %616 = vmatpush3.msra.mxu1 %v136_v13  ;;  %631 = vmatprep.subr.mxu0 %v332_v32  ;;  %p671_p3 = por %p670_p2, %p669_p1 }
  0x14   :  { %642 = vmatprep.subr.mxu1 %v430_v36 }
  0x15   :  { %p672_p4 = pnand %p671_p3, %p665_p0 }
  0xca   :  { %v600_v15 = vpop.f32.mrf.mxu0 }
  0xcb   :  { %v131_v16 = vadd.f32 %v600_v15, %v537_v14 }
  0xcc   :  { %v125_v17 = vpop.f32.mrf.mxu0 }
  0xcd   :  { %v126_v18 = vadd.f32 %v537_v14, %v125_v17  ;;  %v135_v20 = vmax.f32 %v131_v16, 0.0 }
  0xcf   :  { %v134_v19 = vmax.f32 %v126_v18, 0.0 }
  0xd1   :  { %617 = vmatprep.mubr.msk.f32.mxu1 %vm151_vm1, %v134_v19 }
  0xd2   :  { %618 = vmatmul.mubr.msk.f32.vlgmr.msra.gmra.mxu1 %vm151_vm1, %v135_v20 }
  0xd3   :  { %643 = vmatpush3.msra.mxu1 %v430_v36 }
  0xd4   :  { %644 = vmatprep.subr.mxu1 %v429_v37 }
  0xd5   :  { %645 = vmatpush3.msra.mxu1 %v429_v37 }
  0xd6   :  { %646 = vmatprep.subr.mxu1 %v428_v38 }
  0xd7   :  { %647 = vmatpush3.msra.mxu1 %v428_v38 }
  0xd8   :  { %648 = vmatprep.subr.mxu1 %v427_v39 }
  0xd9   :  { %649 = vmatpush3.msra.mxu1 %v427_v39 }
  0xda   :  { %650 = vmatprep.subr.mxu1 %v426_v47 }
  0xdb   :  { %651 = vmatpush3.msra.mxu1 %v426_v47 }
  0xdc   :  { %652 = vmatprep.subr.mxu1 %v425_v48 }
  0xdd   :  { %653 = vmatpush3.msra.mxu1 %v425_v48 }
  0xde   :  { %654 = vmatprep.subr.mxu1 %v424_v49 }
  0xdf   :  { %655 = vmatpush3.msra.mxu1 %v424_v49 }
  0xe0   :  { %656 = vmatprep.subr.mxu1 %v423_v50 }
  0xe1   :  { %657 = vmatpush3.msra.mxu1 %v423_v50 }
 0x192   :  { %v619_v26 = vpop.f32.mrf.mxu1 }
 0x193   :  { %v230_v27 = vadd.f32 %v619_v26, %v540_v25 }
 0x194   :  { %v224_v28 = vpop.f32.mrf.mxu1 }
 0x195   :  { %v225_v29 = vadd.f32 %v540_v25, %v224_v28  ;;  %v234_v31 = vmax.f32 %v230_v27, 0.0 }
 0x197   :  { %v233_v30 = vmax.f32 %v225_v29, 0.0 }
 0x199   :  { %628 = vmatprep.mubr.msk.f32.mxu0 %vm52_vm0, %v233_v30 }
 0x19a   :  { %629 = vmatmul.mubr.msk.f32.vlgmr.msra.gmra.mxu0 %vm52_vm0, %v234_v31 }
 0x19b   :  { %632 = vmatpush3.msra.mxu0 %v332_v32 }
 0x19c   :  { %633 = vmatprep.subr.mxu0 %v331_v33 }
 0x19d   :  { %634 = vmatpush3.msra.mxu0 %v331_v33 }
 0x19e   :  { %635 = vmatprep.subr.mxu0 %v330_v34 }
 0x19f   :  { %636 = vmatpush3.msra.mxu0 %v330_v34 }
 0x1a0   :  { %637 = vmatprep.subr.mxu0 %v329_v35 }
 0x1a1   :  { %638 = vmatpush3.msra.mxu0 %v329_v35 }
 0x25a   :  { %v630_v41 = vpop.f32.mrf.mxu0 }
 0x25b   :  { %v324_v42 = vadd.f32 %v630_v41, %v543_v40 }
 0x25c   :  { %v318_v43 = vpop.f32.mrf.mxu0 }
 0x25d   :  { %v319_v44 = vadd.f32 %v543_v40, %v318_v43  ;;  %v328_v46 = vmax.f32 %v324_v42, 0.0 }
 0x25f   :  { %v327_v45 = vmax.f32 %v319_v44, 0.0 }
 0x261   :  { %639 = vmatprep.mubr.msk.f32.mxu0 %vm52_vm0, %v327_v45 }
 0x262   :  { %640 = vmatmul.mubr.msk.f32.vlgmr.msra.gmra.mxu0 %vm52_vm0, %v328_v46 }
 0x322   :  { %v641_v52 = vpop.f32.mrf.mxu0 }
 0x323   :  { %v418_v53 = vadd.f32 %v641_v52, %v546_v51 }
 0x324   :  { %v412_v54 = vpop.f32.mrf.mxu0 }
 0x325   :  { %v413_v55 = vadd.f32 %v546_v51, %v412_v54  ;;  %v422_v57 = vmax.f32 %v418_v53, 0.0 }
 0x327   :  { %v421_v56 = vmax.f32 %v413_v55, 0.0 }
 0x329   :  { %658 = vmatprep.mubr.msk.f32.mxu1 %vm151_vm1, %v421_v56 }
 0x32a   :  { %659 = vmatmul.mubr.msk.f32.vlgmr.msra.gmra.mxu1 %vm151_vm1, %v422_v57 }
 0x3ea   :  { %v660_v59 = vpop.f32.mrf.mxu1 }
 0x3eb   :  { %v516_v60 = vadd.f32 %v660_v59, %v549_v58 }
 0x3ec   :  { %v510_v61 = vpop.f32.mrf.mxu1 }
 0x3ed   :  { %520 = vst.msk [vmem:[#allocation2 + $0x8] sm:$0xff] %vm52_vm0, %v516_v60  ;;  %v511_v62 = vadd.f32 %v549_v58, %v510_v61 }
 0x3ef   :  { %519 = vst.msk [vmem:[#allocation2] sm:$0xff] %vm52_vm0, %v511_v62 }
 0x3f0   :  { %675 = shalt.err (!%p672_p4)
}
 0x3f1   :  { %s687_s4 = smov 128   ;;  %s688_s10 = smov 8  }
 0x3f2   :  { %532 = dma.vmem_to_hbm [thread:$0]  %s527_s17, 256, %s880_s11, [#allocation3], %s687_s4, %s687_s4, %s688_s10  }
 0x3f3   :  { %684 = dma.done.wait [#allocation3], 256  }
 0x3f4   :  { %685 = vsyncadd [#allocation3], 4294967040 }
 0x3f5   :  { %536 = vsyncpa [#allocation3], 1 }

</bundles_post_ra>
